<compile_context>
chip_gen: v7x
topology: tpu7x:2x2x1
jax: 0.10.0
libtpu: 0.0.40
codegen_flags: <defaults>
</compile_context>

<pallas_src>
import jax
import jax.numpy as jnp
from jax.experimental import pallas as pl
from jax.experimental.pallas import tpu as pltpu


def _scale_kernel(x_ref, s_ref, o_ref):
    # x_ref: (TILE_ROWS, DIM) tile; s_ref: (1, DIM) scale row (broadcast along
    # the sublane axis). Single VPU multiply; astype is a no-op when dtypes
    # already match.
    o_ref[...] = (x_ref[...].astype(o_ref.dtype) * s_ref[...]).astype(o_ref.dtype)


def _sublane_packing(itemsize):
    # f32 -> 8, bf16/fp16 -> 16, int8/fp8 -> 32 sublanes per vreg.
    return max(8, 32 // int(itemsize))


def scale_forward(x, scale, *, tile_rows=None):
    """Apply elementwise scale along the last axis of x using a Pallas kernel.

    x:     (..., dim) array
    scale: (dim,) vector (may be a wider dtype than x; torch promotion kept)
    """
    orig_shape = x.shape
    dim = orig_shape[-1]
    assert scale.shape == (dim,)

    # Match torch type promotion: x(bf16) * scale(f32) -> f32.
    out_dtype = jnp.result_type(x.dtype, scale.dtype)

    x2 = x.reshape(-1, dim)
    rows = x2.shape[0]
    s2 = scale.reshape(1, dim).astype(out_dtype)

    x_itemsize = jnp.dtype(x.dtype).itemsize
    o_itemsize = jnp.dtype(out_dtype).itemsize
    packing = max(_sublane_packing(x_itemsize), _sublane_packing(o_itemsize))

    if tile_rows is None:
        # ~2 MiB per x tile; with double-buffered in + out that's ~8-ish MiB of
        # VMEM, comfortably under the 32 MiB scoped default on v5e/v6e/v7x.
        target_bytes = 2 * 1024 * 1024
        t = max(packing, target_bytes // max(1, dim * x_itemsize))
        t = max(packing, (t // packing) * packing)
        rows_rounded = ((rows + packing - 1) // packing) * packing
        tile_rows = min(t, rows_rounded)

    grid = (pl.cdiv(rows, tile_rows),)

    # Advisory cost hint: pure streaming multiply (read x + write out + scale).
    cost = pl.CostEstimate(
        flops=rows * dim,
        transcendentals=0,
        bytes_accessed=rows * dim * (x_itemsize + o_itemsize) + dim * o_itemsize,
    )

    # TODO(synk): for call sites with dim < 128, fold k rows into the lane axis
    # (reshape to (rows/k, k*dim) + tiled scale) to keep stores lane-dense.
    out = pl.pallas_call(
        _scale_kernel,
        out_shape=jax.ShapeDtypeStruct((rows, dim), out_dtype),
        grid_spec=pltpu.PrefetchScalarGridSpec(
            num_scalar_prefetch=0,
            grid=grid,
            in_specs=[
                pl.BlockSpec((tile_rows, dim), lambda i: (i, 0)),
                pl.BlockSpec((1, dim), lambda i: (0, 0)),  # resident scale row
            ],
            out_specs=pl.BlockSpec((tile_rows, dim), lambda i: (i, 0)),
        ),
        compiler_params=pltpu.CompilerParams(
            dimension_semantics=("parallel",),
        ),
        cost_estimate=cost,
    )(x2, s2)

    return out.reshape(orig_shape)


if __name__ == "__main__":
    key = jax.random.PRNGKey(0)
    batch, seq, dim = 2, 8, 128

    # Deterministic parameter init matching Scale(dim, init_value=1.0):
    # scale = init_value * ones(dim), perturbed deterministically so the
    # multiply is non-trivial.
    init_value = 1.0
    scale = init_value * jnp.ones((dim,), dtype=jnp.float32)
    scale = scale + 0.01 * jnp.arange(dim, dtype=jnp.float32)

    x = jax.random.normal(key, (batch, seq, dim), dtype=jnp.float32)

    y = scale_forward(x, scale)
    y = jax.block_until_ready(y)

    # Reference check against plain JAX broadcasting (same as torch x * scale).
    y_ref = x * scale
    assert y.shape == x.shape
    assert y.dtype == y_ref.dtype
    assert jnp.allclose(y, y_ref, atol=1e-6), "mismatch vs reference"

    print("KERNEL_OK")
</pallas_src>

<mosaic_0001>
module attributes {stable_mosaic.version = 11 : i64} {
  func.func @_scale_kernel(%arg0: i32, %arg1: memref<16x128xf32, #tpu.memory_space<vmem>>, %arg2: memref<1x128xf32, #tpu.memory_space<vmem>>, %arg3: memref<16x128xf32, #tpu.memory_space<vmem>>) attributes {dimension_semantics = [#tpu.dimension_semantics<parallel>], iteration_bounds = array<i64: 1>, scalar_prefetch = 0 : i64, scratch_operands = 0 : i64, tpu.core_type = #tpu.core_type<tc>, window_params = [{transform_indices = @transform_0, window_bounds = array<i64: 16, 128>}, {pipeline_mode = #tpu.pipeline_mode<synchronous>, transform_indices = @transform_1, window_bounds = array<i64: 1, 128>}, {transform_indices = @transform_2, window_bounds = array<i64: 16, 128>}]} {
    %c0 = arith.constant 0 : index
    %c0_0 = arith.constant 0 : index
    %0 = vector.load %arg1[%c0, %c0_0] : memref<16x128xf32, #tpu.memory_space<vmem>>, vector<16x128xf32>
    %c0_1 = arith.constant 0 : index
    %c0_2 = arith.constant 0 : index
    %1 = vector.load %arg2[%c0_1, %c0_2] : memref<1x128xf32, #tpu.memory_space<vmem>>, vector<1x128xf32>
    %2 = vector.broadcast %1 : vector<1x128xf32> to vector<16x128xf32>
    %3 = arith.mulf %0, %2 : vector<16x128xf32>
    %c0_3 = arith.constant 0 : index
    %c0_4 = arith.constant 0 : index
    %4 = vector.load %arg3[%c0_3, %c0_4] : memref<16x128xf32, #tpu.memory_space<vmem>>, vector<16x128xf32>
    tpu.vector_store %arg3[%c0_3, %c0_4], %3 {strides = array<i32>} : memref<16x128xf32, #tpu.memory_space<vmem>>, vector<16x128xf32>,
    return
  }
  func.func @transform_0(%arg0: i32) -> (i32, i32) {
    %c0_i32 = arith.constant 0 : i32
    %c0_i32_0 = arith.constant 0 : i32
    return %arg0, %c0_i32 : i32, i32
  }
  func.func @transform_1(%arg0: i32) -> (i32, i32) {
    %c0_i32 = arith.constant 0 : i32
    %c0_i32_0 = arith.constant 0 : i32
    %c0_i32_1 = arith.constant 0 : i32
    return %c0_i32, %c0_i32_0 : i32, i32
  }
  func.func @transform_2(%arg0: i32) -> (i32, i32) {
    %c0_i32 = arith.constant 0 : i32
    %c0_i32_0 = arith.constant 0 : i32
    return %arg0, %c0_i32 : i32, i32
  }
}

</mosaic_0001>

<bundles_post_ra>
// kernel: tpu_custom_call.1
= control target key start
LH: loop header
LB: loop body
LE: loop exit
PB: predicated region body
PF: predicated region fallthrough
CT: control target
= control target key end

     0   :  { %7 = vsyncpa [#allocation3], 0  ;;  %s161_s0 = inlined_call_operand.hbm [shape: f32[16,128], index: 0, kind: input, shape index: {}]   ;;  %s162_s1 = inlined_call_operand.vmem [shape: f32[1,128], index: 1, kind: input, shape index: {}]   ;;  %s163_s2 = inlined_call_operand.hbm [shape: f32[16,128], index: 2, kind: output, shape index: {}]  }
   0x1   :  { %8 = vsyncpa [#allocation4], 0  ;;  %s109_s9 = smov [#allocation2]   ;;  %s61_s13 = scalar_lea.hbm %s161_s0, 256 }
   0x2   :  { %s14_s10 = sshll.u32 %s109_s9, 4  ;;  %p62_p0 = scmp.ne.s32.totalorder %s161_s0, %s61_s13  ;;  %s15_s10 = int_to_ptr.vmem [resolvable:$true] %s14_s10 }
   0x3   :  { %p65_p1 = scmp.lt.u32.totalorder %s61_s13, %s161_s0 }
   0x5   :  { %p67_p2 = pnand %p65_p1, %p62_p0 }
   0x7   :  { %70 = shalt.err (!%p67_p2)
}
   0x8   :  { %s71_s18 = scalar_lea.vmem %s15_s10, 256  ;;  %p76_p4 = scmp.lt.s32.totalorder %s15_s10, %s15_s10 }
   0x9   :  { %p72_p3 = scmp.ne.s32.totalorder %s15_s10, %s71_s18  ;;  %p77_p5 = scmp.lt.s32.totalorder %s71_s18, %s71_s18 }
   0xb   :  { %p78_p6 = por %p77_p5, %p76_p4 }
   0xd   :  { %p79_p7 = pnand %p78_p6, %p72_p3 }
   0xf   :  { %82 = shalt.err (!%p79_p7)
}
  0x10   :  { %s110_s19 = smov 128   ;;  %s111_s20 = smov 8  }
  0x11   :  { %20 = dma.hbm_to_vmem [thread:$0]  %s161_s0, 256, %s15_s10, [#allocation3], %s110_s19, %s110_s19, %s111_s20  }
  0x12   :  { %105 = dma.done.wait [#allocation3], 256  }
  0x13   :  { %106 = vsyncadd [#allocation3], 4294967040  ;;  %s112_s23 = smov [#allocation5]   ;;  %v26_v0 = vld [vmem:[#allocation2] sm:$0xff]  ;;  %v27_v2 = vld [vmem:[#allocation2 + $0x8] sm:$0xff] }
  0x14   :  { %s44_s24 = sshll.u32 %s112_s23, 4  ;;  %v56_v1 = vld [vmem:[%s162_s1] ss:$0 sm:$0xff]  ;;  %s45_s24 = int_to_ptr.vmem [resolvable:$true] %s44_s24 }
  0x15   :  { %v35_v3 = vmul.f32 %v56_v1, %v26_v0  ;;  %v36_v4 = vmul.f32 %v56_v1, %v27_v2  ;;  %s83_s27 = scalar_lea.vmem %s45_s24, 256  ;;  %p88_p9 = scmp.lt.s32.totalorder %s45_s24, %s45_s24 }
  0x16   :  { %p84_p8 = scmp.ne.s32.totalorder %s45_s24, %s83_s27  ;;  %p89_p10 = scmp.lt.s32.totalorder %s83_s27, %s83_s27 }
  0x17   :  { %37 = vst [vmem:[#allocation5] sm:$0xff] %v35_v3  ;;  %38 = vst [vmem:[#allocation5 + $0x8] sm:$0xff] %v36_v4 }
  0x18   :  { %p90_p11 = por %p89_p10, %p88_p9 }
  0x1a   :  { %p91_p12 = pnand %p90_p11, %p84_p8 }
  0x1c   :  { %94 = shalt.err (!%p91_p12)
}
  0x1d   :  { %s95_s29 = scalar_lea.hbm %s163_s2, 256 }
  0x1e   :  { %p96_p13 = scmp.ne.s32.totalorder %s163_s2, %s95_s29  ;;  %p99_p0 = scmp.lt.u32.totalorder %s95_s29, %s163_s2 }
  0x20   :  { %p101_p1 = pnand %p99_p0, %p96_p13 }
  0x22   :  { %104 = shalt.err (!%p101_p1)
}
  0x23   :  { %50 = dma.vmem_to_hbm [thread:$0]  %s45_s24, 256, %s163_s2, [#allocation4], %s110_s19, %s110_s19, %s111_s20  }
  0x24   :  { %107 = dma.done.wait [#allocation4], 256  }
  0x25   :  { %108 = vsyncadd [#allocation4], 4294967040 }
  0x26   :  { %54 = vsyncpa [#allocation3], 1 }
  0x27   :  { %55 = vsyncpa [#allocation4], 1 }

</bundles_post_ra>
